<compile_context>
chip_gen: v7x
topology: tpu7x:2x2x1
jax: 0.10.0
libtpu: 0.0.40
codegen_flags: <defaults>
</compile_context>

<pallas_src>
import functools
import math

import jax
import jax.numpy as jnp
from jax.experimental import pallas as pl
from jax.experimental.pallas import tpu as pltpu


def _spatial_attention_kernel(
    x_ref,      # (Bb*S, Din)    input rows for this grid step
    wqkv_ref,   # (Din, 3*Dout)  fused wq|wk|wv, compute dtype, scale folded into Q cols
    bqkv_ref,   # (1, 3*Dout)    f32, scale folded into Q cols
    wo_ref,     # (Dout, Din)    compute dtype
    bo_ref,     # (1, Din)       f32
    o_ref,      # (Bb*S, Din)
    *,
    num_heads: int,
    seq_len: int,
    d_out: int,
    compute_dtype,
):
    rows = x_ref.shape[0]
    bb = rows // seq_len
    d_head = d_out // num_heads

    # ---- Fused Q|K|V projection: one wide MXU matmul, bf16 in / f32 acc. ----
    x = x_ref[...].astype(compute_dtype)
    qkv = jnp.dot(x, wqkv_ref[...], preferred_element_type=jnp.float32)
    qkv = qkv + bqkv_ref[...]                                   # (rows, 3*Dout) f32

    # Split Q/K/V and expose the batch dim for the batched attention matmuls.
    q = qkv[:, 0:d_out].astype(compute_dtype).reshape(bb, seq_len, d_out)
    k = qkv[:, d_out:2 * d_out].astype(compute_dtype).reshape(bb, seq_len, d_out)
    v = qkv[:, 2 * d_out:3 * d_out].astype(compute_dtype).reshape(bb, seq_len, d_out)

    # ---- Attention: one batched dot_general per head (batch dim = Bb). ----
    # num_heads is small & static, so this traces to only H bodies.
    # TODO(synk): for large S (>= ~512), replace the dense (S, S) scores with a
    # flash-style KV-tiled online-softmax inner loop to bound the working set.
    ctx_heads = []
    for h in range(num_heads):
        c = h * d_head
        qh = q[:, :, c:c + d_head]                              # (Bb, S, Dh)
        kh = k[:, :, c:c + d_head]
        vh = v[:, :, c:c + d_head]

        # Contract the last axes of both operands (no kh.T materialized);
        # the 1/sqrt(Dh) scale is already folded into the Q weights/bias.
        s = jnp.einsum("bqd,bkd->bqk", qh, kh,
                       preferred_element_type=jnp.float32)      # (Bb, S, S)

        # Numerically-stable softmax over the last axis; exact reciprocal on
        # the (otherwise idle) EUP slot.
        m = jnp.max(s, axis=-1, keepdims=True)
        e = jnp.exp(s - m)
        denom = jnp.sum(e, axis=-1, keepdims=True)
        p = e * pl.reciprocal(denom, approx=False)              # (Bb, S, S)

        ctx_heads.append(
            jnp.einsum("bqk,bkd->bqd", p.astype(compute_dtype), vh,
                       preferred_element_type=jnp.float32))     # (Bb, S, Dh)

    # Head recombination stays in registers: lane-axis concat (matches the
    # PyTorch combine_heads feature layout) + one leading-dim merge reshape.
    ctx = jnp.concatenate(ctx_heads, axis=-1).reshape(rows, d_out)  # (rows, Dout)

    # ---- Output projection back to input_dim over the whole row slab. ----
    out = jnp.dot(ctx.astype(compute_dtype), wo_ref[...],
                  preferred_element_type=jnp.float32) + bo_ref[...]
    o_ref[...] = out.astype(o_ref.dtype)                        # lane-dense store


def _pick_batch_block(B: int, S: int, target_rows: int = 1024) -> int:
    """Divisor of B giving large (<= target_rows) sublane-aligned row slabs
    while keeping >= 2 grid steps (both v7x TensorCores busy, pipelining)."""
    divisors = [d for d in range(1, B + 1) if B % d == 0]
    aligned = [d for d in divisors if (d * S) % 8 == 0 or d == B] or [B]
    fitting = [d for d in aligned if d * S <= target_rows] or [min(aligned)]
    multi_step = [d for d in fitting if B // d >= 2]
    return max(multi_step or fitting)


def _vmem_limit_bytes(rows: int, d_in: int, d_out: int, compute_itemsize: int) -> int:
    f32 = 4
    io_blocks = 2 * 2 * rows * d_in * f32                       # x & out, double-buffered
    weights = 2 * (d_in * 3 * d_out * compute_itemsize + 3 * d_out * f32
                   + d_out * d_in * compute_itemsize + d_in * f32)
    interm = 4 * rows * 3 * d_out * f32                         # qkv/q/k/v/ctx slack
    est = io_blocks + weights + interm
    # Clamp: >= 32 MiB (raise v5e's 16 MiB scoped default), <= 60 MiB so the
    # limit stays inside v7x's 64 MiB physical VMEM (v5e/v6e have 128 MiB).
    return int(min(max(est, 32 * 1024 * 1024), 60 * 1024 * 1024))


def spatial_attention(x, params, *, num_heads=4, batch_block=None,
                      compute_dtype=jnp.bfloat16):
    """x: [B, S, Din] -> [B, S, Din]   (fused multi-head self-attention).

    compute_dtype is the MXU operand dtype (bf16 by default; pass jnp.float32
    for bit-closer parity with the f32 PyTorch module at lower MXU throughput).
    """
    B, S, Din = x.shape
    Dout = params["wq"].shape[1]
    assert Dout % num_heads == 0
    d_head = Dout // num_heads

    if batch_block is None:
        batch_block = _pick_batch_block(B, S)
    assert B % batch_block == 0
    rows_per_step = batch_block * S

    # Fuse Q/K/V weights & biases, folding 1/sqrt(Dh) into the Q columns
    # (weight-sized ops, constant-folded by XLA).  Weights are stored in the
    # MXU compute dtype so their DMA/VMEM footprint is halved; biases stay f32.
    scale = 1.0 / math.sqrt(d_head)
    wqkv = jnp.concatenate(
        [params["wq"] * scale, params["wk"], params["wv"]], axis=1
    ).astype(compute_dtype)                                     # (Din, 3*Dout)
    bqkv = jnp.concatenate(
        [params["bq"] * scale, params["bk"], params["bv"]], axis=1
    ).astype(jnp.float32)                                       # (1, 3*Dout)
    wo = params["wo"].astype(compute_dtype)                     # (Dout, Din)
    bo = params["bo"].astype(jnp.float32)                       # (1, Din)

    # Lane/sublane-dense layout: flatten batch+sequence into the row axis.
    # TODO(synk): at real model dims, pad Din/Dout up to multiples of 128 here
    # so head-column slices and the output store are lane-tile aligned.
    x2d = x.reshape(B * S, Din)

    kernel = functools.partial(
        _spatial_attention_kernel,
        num_heads=num_heads, seq_len=S, d_out=Dout, compute_dtype=compute_dtype)

    # Weights/biases are grid-invariant: Pallas only re-issues the DMA when the
    # block index changes, so they are fetched once.  At very large Din/Dout,
    # additionally pass pipeline_mode=pl.Buffered(1) to drop their 2nd buffer.
    invariant = lambda i: (0, 0)

    out2d = pl.pallas_call(
        kernel,
        out_shape=jax.ShapeDtypeStruct((B * S, Din), x.dtype),
        grid_spec=pltpu.PrefetchScalarGridSpec(
            num_scalar_prefetch=0,
            grid=(B // batch_block,),
            in_specs=[
                pl.BlockSpec((rows_per_step, Din), lambda i: (i, 0)),   # x rows
                pl.BlockSpec((Din, 3 * Dout), invariant),               # wqkv
                pl.BlockSpec((1, 3 * Dout), invariant),                 # bqkv
                pl.BlockSpec((Dout, Din), invariant),                   # wo
                pl.BlockSpec((1, Din), invariant),                      # bo
            ],
            out_specs=pl.BlockSpec((rows_per_step, Din), lambda i: (i, 0)),
        ),
        compiler_params=pltpu.CompilerParams(
            dimension_semantics=("parallel",),
            vmem_limit_bytes=_vmem_limit_bytes(
                rows_per_step, Din, Dout, jnp.dtype(compute_dtype).itemsize),
        ),
    )(x2d, wqkv, bqkv, wo, bo)

    return out2d.reshape(B, S, Din)


def init_params(key, input_dim, output_dim):
    """Deterministic synthetic parameters (nn.Linear-like, stored transposed)."""
    ks = jax.random.split(key, 8)
    s_in = 1.0 / math.sqrt(input_dim)
    s_out = 1.0 / math.sqrt(output_dim)
    return {
        "wq": jax.random.uniform(ks[0], (input_dim, output_dim), jnp.float32, -s_in, s_in),
        "bq": jax.random.uniform(ks[1], (1, output_dim), jnp.float32, -s_in, s_in),
        "wk": jax.random.uniform(ks[2], (input_dim, output_dim), jnp.float32, -s_in, s_in),
        "bk": jax.random.uniform(ks[3], (1, output_dim), jnp.float32, -s_in, s_in),
        "wv": jax.random.uniform(ks[4], (input_dim, output_dim), jnp.float32, -s_in, s_in),
        "bv": jax.random.uniform(ks[5], (1, output_dim), jnp.float32, -s_in, s_in),
        "wo": jax.random.uniform(ks[6], (output_dim, input_dim), jnp.float32, -s_out, s_out),
        "bo": jax.random.uniform(ks[7], (1, input_dim), jnp.float32, -s_out, s_out),
    }


def spatial_attention_ref(x, params, *, num_heads=4):
    """Pure-JAX f32 reference mirroring the PyTorch forward exactly."""
    B, S, Din = x.shape
    q = x @ params["wq"] + params["bq"]
    k = x @ params["wk"] + params["bk"]
    v = x @ params["wv"] + params["bv"]
    Dout = q.shape[-1]
    Dh = Dout // num_heads

    def split(t):  # [B,S,Dout] -> [B,H,S,Dh]
        return t.reshape(B, S, num_heads, Dh).transpose(0, 2, 1, 3)

    Q, K, V = split(q), split(k), split(v)
    scores = jnp.einsum("bhqd,bhkd->bhqk", Q, K) / math.sqrt(Dh)
    w = jax.nn.softmax(scores, axis=-1)
    attended = jnp.einsum("bhqk,bhkd->bhqd", w, V)
    combined = attended.transpose(0, 2, 1, 3).reshape(B, S, Dout)
    return combined @ params["wo"] + params["bo"]


if __name__ == "__main__":
    key = jax.random.PRNGKey(0)
    k_x, k_p = jax.random.split(key)

    B, S, input_dim, output_dim, num_heads = 2, 8, 32, 32, 4
    x = jax.random.normal(k_x, (B, S, input_dim), jnp.float32)
    params = init_params(k_p, input_dim, output_dim)

    out = spatial_attention(x, params, num_heads=num_heads)
    out = jax.block_until_ready(out)

    ref = spatial_attention_ref(x, params, num_heads=num_heads)
    assert out.shape == (B, S, input_dim)
    # bf16 MXU operands (f32 accumulation) trade ~1e-2 relative error for the
    # bf16-native MXU rate; tolerance is set accordingly vs. the f32 reference.
    assert jnp.allclose(out, ref, atol=2e-2, rtol=2e-2), "mismatch vs. pure-JAX reference"

    print("KERNEL_OK")
</pallas_src>

<mosaic_0001>
module attributes {stable_mosaic.version = 11 : i64} {
  func.func @_spatial_attention_kernel(%arg0: i32, %arg1: memref<8x32xf32, #tpu.memory_space<vmem>>, %arg2: memref<32x96xbf16, #tpu.memory_space<vmem>>, %arg3: memref<1x96xf32, #tpu.memory_space<vmem>>, %arg4: memref<32x32xbf16, #tpu.memory_space<vmem>>, %arg5: memref<1x32xf32, #tpu.memory_space<vmem>>, %arg6: memref<8x32xf32, #tpu.memory_space<vmem>>) attributes {dimension_semantics = [#tpu.dimension_semantics<parallel>], iteration_bounds = array<i64: 2>, scalar_prefetch = 0 : i64, scratch_operands = 0 : i64, tpu.core_type = #tpu.core_type<tc>, window_params = [{transform_indices = @transform_0, window_bounds = array<i64: 8, 32>}, {pipeline_mode = #tpu.pipeline_mode<synchronous>, transform_indices = @transform_1, window_bounds = array<i64: 32, 96>}, {pipeline_mode = #tpu.pipeline_mode<synchronous>, transform_indices = @transform_2, window_bounds = array<i64: 1, 96>}, {pipeline_mode = #tpu.pipeline_mode<synchronous>, transform_indices = @transform_3, window_bounds = array<i64: 32, 32>}, {pipeline_mode = #tpu.pipeline_mode<synchronous>, transform_indices = @transform_4, window_bounds = array<i64: 1, 32>}, {transform_indices = @transform_5, window_bounds = array<i64: 8, 32>}]} {
    %c0 = arith.constant 0 : index
    %c0_0 = arith.constant 0 : index
    %0 = vector.load %arg1[%c0, %c0_0] : memref<8x32xf32, #tpu.memory_space<vmem>>, vector<8x32xf32>
    %1 = arith.truncf %0 : vector<8x32xf32> to vector<8x32xbf16>
    %c0_1 = arith.constant 0 : index
    %c0_2 = arith.constant 0 : index
    %2 = vector.load %arg2[%c0_1, %c0_2] : memref<32x96xbf16, #tpu.memory_space<vmem>>, vector<32x96xbf16>
    %cst = arith.constant dense<0.000000e+00> : vector<8x96xf32>
    %3 = tpu.matmul %1, %2, %cst {dimension_numbers = #tpu.dot_dimension_numbers<[1], [0], [0], [1], [0, 0, 1, 1], [], []>} : vector<8x32xbf16>, vector<32x96xbf16>, vector<8x96xf32> -> vector<8x96xf32>
    %c0_3 = arith.constant 0 : index
    %c0_4 = arith.constant 0 : index
    %4 = vector.load %arg3[%c0_3, %c0_4] : memref<1x96xf32, #tpu.memory_space<vmem>>, vector<1x96xf32>
    %5 = vector.broadcast %4 : vector<1x96xf32> to vector<8x96xf32>
    %6 = arith.addf %3, %5 : vector<8x96xf32>
    %7 = vector.extract_strided_slice %6 {offsets = [0, 0], sizes = [8, 32], strides = [1, 1]} : vector<8x96xf32> to vector<8x32xf32>
    %8 = arith.truncf %7 : vector<8x32xf32> to vector<8x32xbf16>
    %9 = vector.shape_cast %8 : vector<8x32xbf16> to vector<1x8x32xbf16>
    %10 = vector.extract_strided_slice %6 {offsets = [0, 32], sizes = [8, 32], strides = [1, 1]} : vector<8x96xf32> to vector<8x32xf32>
    %11 = arith.truncf %10 : vector<8x32xf32> to vector<8x32xbf16>
    %12 = vector.shape_cast %11 : vector<8x32xbf16> to vector<1x8x32xbf16>
    %13 = vector.extract_strided_slice %6 {offsets = [0, 64], sizes = [8, 32], strides = [1, 1]} : vector<8x96xf32> to vector<8x32xf32>
    %14 = arith.truncf %13 : vector<8x32xf32> to vector<8x32xbf16>
    %15 = vector.shape_cast %14 : vector<8x32xbf16> to vector<1x8x32xbf16>
    %16 = vector.extract_strided_slice %9 {offsets = [0, 0, 0], sizes = [1, 8, 8], strides = [1, 1, 1]} : vector<1x8x32xbf16> to vector<1x8x8xbf16>
    %17 = vector.extract_strided_slice %12 {offsets = [0, 0, 0], sizes = [1, 8, 8], strides = [1, 1, 1]} : vector<1x8x32xbf16> to vector<1x8x8xbf16>
    %18 = vector.extract_strided_slice %15 {offsets = [0, 0, 0], sizes = [1, 8, 8], strides = [1, 1, 1]} : vector<1x8x32xbf16> to vector<1x8x8xbf16>
    "tpu.trace_start"() <{level = 10 : i32, message = "bqd,bkd->bqk"}> : () -> ()
    %cst_5 = arith.constant dense<0.000000e+00> : vector<1x8x8xf32>
    %19 = tpu.matmul %16, %17, %cst_5 {dimension_numbers = #tpu.dot_dimension_numbers<[2], [2], [1], [1], [0, 0, 0, 1, 1, 1], [0], [0]>} : vector<1x8x8xbf16>, vector<1x8x8xbf16>, vector<1x8x8xf32> -> vector<1x8x8xf32>
    "tpu.trace_stop"() : () -> ()
    %cst_6 = arith.constant dense<0xFF800000> : vector<1x8xf32>
    %20 = vector.multi_reduction <maximumf>, %19, %cst_6 [2] : vector<1x8x8xf32> to vector<1x8xf32>
    %21 = vector.shape_cast %20 : vector<1x8xf32> to vector<1x8x1xf32>
    %22 = vector.broadcast %21 : vector<1x8x1xf32> to vector<1x8x8xf32>
    %23 = arith.subf %19, %22 : vector<1x8x8xf32>
    %24 = math.exp %23 : vector<1x8x8xf32>
    %cst_7 = arith.constant dense<0.000000e+00> : vector<1x8xf32>
    %25 = vector.multi_reduction <add>, %24, %cst_7 [2] : vector<1x8x8xf32> to vector<1x8xf32>
    %26 = vector.shape_cast %25 : vector<1x8xf32> to vector<1x8x1xf32>
    %27 = tpu.reciprocal %26 : vector<1x8x1xf32> -> vector<1x8x1xf32>
    %28 = vector.broadcast %27 : vector<1x8x1xf32> to vector<1x8x8xf32>
    %29 = arith.mulf %24, %28 : vector<1x8x8xf32>
    %30 = arith.truncf %29 : vector<1x8x8xf32> to vector<1x8x8xbf16>
    "tpu.trace_start"() <{level = 10 : i32, message = "bqk,bkd->bqd"}> : () -> ()
    %cst_8 = arith.constant dense<0.000000e+00> : vector<1x8x8xf32>
    %31 = tpu.matmul %30, %18, %cst_8 {dimension_numbers = #tpu.dot_dimension_numbers<[2], [1], [1], [2], [0, 0, 0, 1, 1, 2], [0], [0]>} : vector<1x8x8xbf16>, vector<1x8x8xbf16>, vector<1x8x8xf32> -> vector<1x8x8xf32>
    "tpu.trace_stop"() : () -> ()
    %32 = vector.extract_strided_slice %9 {offsets = [0, 0, 8], sizes = [1, 8, 8], strides = [1, 1, 1]} : vector<1x8x32xbf16> to vector<1x8x8xbf16>
    %33 = vector.extract_strided_slice %12 {offsets = [0, 0, 8], sizes = [1, 8, 8], strides = [1, 1, 1]} : vector<1x8x32xbf16> to vector<1x8x8xbf16>
    %34 = vector.extract_strided_slice %15 {offsets = [0, 0, 8], sizes = [1, 8, 8], strides = [1, 1, 1]} : vector<1x8x32xbf16> to vector<1x8x8xbf16>
    "tpu.trace_start"() <{level = 10 : i32, message = "bqd,bkd->bqk"}> : () -> ()
    %cst_9 = arith.constant dense<0.000000e+00> : vector<1x8x8xf32>
    %35 = tpu.matmul %32, %33, %cst_9 {dimension_numbers = #tpu.dot_dimension_numbers<[2], [2], [1], [1], [0, 0, 0, 1, 1, 1], [0], [0]>} : vector<1x8x8xbf16>, vector<1x8x8xbf16>, vector<1x8x8xf32> -> vector<1x8x8xf32>
    "tpu.trace_stop"() : () -> ()
    %cst_10 = arith.constant dense<0xFF800000> : vector<1x8xf32>
    %36 = vector.multi_reduction <maximumf>, %35, %cst_10 [2] : vector<1x8x8xf32> to vector<1x8xf32>
    %37 = vector.shape_cast %36 : vector<1x8xf32> to vector<1x8x1xf32>
    %38 = vector.broadcast %37 : vector<1x8x1xf32> to vector<1x8x8xf32>
    %39 = arith.subf %35, %38 : vector<1x8x8xf32>
    %40 = math.exp %39 : vector<1x8x8xf32>
    %cst_11 = arith.constant dense<0.000000e+00> : vector<1x8xf32>
    %41 = vector.multi_reduction <add>, %40, %cst_11 [2] : vector<1x8x8xf32> to vector<1x8xf32>
    %42 = vector.shape_cast %41 : vector<1x8xf32> to vector<1x8x1xf32>
    %43 = tpu.reciprocal %42 : vector<1x8x1xf32> -> vector<1x8x1xf32>
    %44 = vector.broadcast %43 : vector<1x8x1xf32> to vector<1x8x8xf32>
    %45 = arith.mulf %40, %44 : vector<1x8x8xf32>
    %46 = arith.truncf %45 : vector<1x8x8xf32> to vector<1x8x8xbf16>
    "tpu.trace_start"() <{level = 10 : i32, message = "bqk,bkd->bqd"}> : () -> ()
    %cst_12 = arith.constant dense<0.000000e+00> : vector<1x8x8xf32>
    %47 = tpu.matmul %46, %34, %cst_12 {dimension_numbers = #tpu.dot_dimension_numbers<[2], [1], [1], [2], [0, 0, 0, 1, 1, 2], [0], [0]>} : vector<1x8x8xbf16>, vector<1x8x8xbf16>, vector<1x8x8xf32> -> vector<1x8x8xf32>
    "tpu.trace_stop"() : () -> ()
    %48 = vector.extract_strided_slice %9 {offsets = [0, 0, 16], sizes = [1, 8, 8], strides = [1, 1, 1]} : vector<1x8x32xbf16> to vector<1x8x8xbf16>
    %49 = vector.extract_strided_slice %12 {offsets = [0, 0, 16], sizes = [1, 8, 8], strides = [1, 1, 1]} : vector<1x8x32xbf16> to vector<1x8x8xbf16>
    %50 = vector.extract_strided_slice %15 {offsets = [0, 0, 16], sizes = [1, 8, 8], strides = [1, 1, 1]} : vector<1x8x32xbf16> to vector<1x8x8xbf16>
    "tpu.trace_start"() <{level = 10 : i32, message = "bqd,bkd->bqk"}> : () -> ()
    %cst_13 = arith.constant dense<0.000000e+00> : vector<1x8x8xf32>
    %51 = tpu.matmul %48, %49, %cst_13 {dimension_numbers = #tpu.dot_dimension_numbers<[2], [2], [1], [1], [0, 0, 0, 1, 1, 1], [0], [0]>} : vector<1x8x8xbf16>, vector<1x8x8xbf16>, vector<1x8x8xf32> -> vector<1x8x8xf32>
    "tpu.trace_stop"() : () -> ()
    %cst_14 = arith.constant dense<0xFF800000> : vector<1x8xf32>
    %52 = vector.multi_reduction <maximumf>, %51, %cst_14 [2] : vector<1x8x8xf32> to vector<1x8xf32>
    %53 = vector.shape_cast %52 : vector<1x8xf32> to vector<1x8x1xf32>
    %54 = vector.broadcast %53 : vector<1x8x1xf32> to vector<1x8x8xf32>
    %55 = arith.subf %51, %54 : vector<1x8x8xf32>
    %56 = math.exp %55 : vector<1x8x8xf32>
    %cst_15 = arith.constant dense<0.000000e+00> : vector<1x8xf32>
    %57 = vector.multi_reduction <add>, %56, %cst_15 [2] : vector<1x8x8xf32> to vector<1x8xf32>
    %58 = vector.shape_cast %57 : vector<1x8xf32> to vector<1x8x1xf32>
    %59 = tpu.reciprocal %58 : vector<1x8x1xf32> -> vector<1x8x1xf32>
    %60 = vector.broadcast %59 : vector<1x8x1xf32> to vector<1x8x8xf32>
    %61 = arith.mulf %56, %60 : vector<1x8x8xf32>
    %62 = arith.truncf %61 : vector<1x8x8xf32> to vector<1x8x8xbf16>
    "tpu.trace_start"() <{level = 10 : i32, message = "bqk,bkd->bqd"}> : () -> ()
    %cst_16 = arith.constant dense<0.000000e+00> : vector<1x8x8xf32>
    %63 = tpu.matmul %62, %50, %cst_16 {dimension_numbers = #tpu.dot_dimension_numbers<[2], [1], [1], [2], [0, 0, 0, 1, 1, 2], [0], [0]>} : vector<1x8x8xbf16>, vector<1x8x8xbf16>, vector<1x8x8xf32> -> vector<1x8x8xf32>
    "tpu.trace_stop"() : () -> ()
    %64 = vector.extract_strided_slice %9 {offsets = [0, 0, 24], sizes = [1, 8, 8], strides = [1, 1, 1]} : vector<1x8x32xbf16> to vector<1x8x8xbf16>
    %65 = vector.extract_strided_slice %12 {offsets = [0, 0, 24], sizes = [1, 8, 8], strides = [1, 1, 1]} : vector<1x8x32xbf16> to vector<1x8x8xbf16>
    %66 = vector.extract_strided_slice %15 {offsets = [0, 0, 24], sizes = [1, 8, 8], strides = [1, 1, 1]} : vector<1x8x32xbf16> to vector<1x8x8xbf16>
    "tpu.trace_start"() <{level = 10 : i32, message = "bqd,bkd->bqk"}> : () -> ()
    %cst_17 = arith.constant dense<0.000000e+00> : vector<1x8x8xf32>
    %67 = tpu.matmul %64, %65, %cst_17 {dimension_numbers = #tpu.dot_dimension_numbers<[2], [2], [1], [1], [0, 0, 0, 1, 1, 1], [0], [0]>} : vector<1x8x8xbf16>, vector<1x8x8xbf16>, vector<1x8x8xf32> -> vector<1x8x8xf32>
    "tpu.trace_stop"() : () -> ()
    %cst_18 = arith.constant dense<0xFF800000> : vector<1x8xf32>
    %68 = vector.multi_reduction <maximumf>, %67, %cst_18 [2] : vector<1x8x8xf32> to vector<1x8xf32>
    %69 = vector.shape_cast %68 : vector<1x8xf32> to vector<1x8x1xf32>
    %70 = vector.broadcast %69 : vector<1x8x1xf32> to vector<1x8x8xf32>
    %71 = arith.subf %67, %70 : vector<1x8x8xf32>
    %72 = math.exp %71 : vector<1x8x8xf32>
    %cst_19 = arith.constant dense<0.000000e+00> : vector<1x8xf32>
    %73 = vector.multi_reduction <add>, %72, %cst_19 [2] : vector<1x8x8xf32> to vector<1x8xf32>
    %74 = vector.shape_cast %73 : vector<1x8xf32> to vector<1x8x1xf32>
    %75 = tpu.reciprocal %74 : vector<1x8x1xf32> -> vector<1x8x1xf32>
    %76 = vector.broadcast %75 : vector<1x8x1xf32> to vector<1x8x8xf32>
    %77 = arith.mulf %72, %76 : vector<1x8x8xf32>
    %78 = arith.truncf %77 : vector<1x8x8xf32> to vector<1x8x8xbf16>
    "tpu.trace_start"() <{level = 10 : i32, message = "bqk,bkd->bqd"}> : () -> ()
    %cst_20 = arith.constant dense<0.000000e+00> : vector<1x8x8xf32>
    %79 = tpu.matmul %78, %66, %cst_20 {dimension_numbers = #tpu.dot_dimension_numbers<[2], [1], [1], [2], [0, 0, 0, 1, 1, 2], [0], [0]>} : vector<1x8x8xbf16>, vector<1x8x8xbf16>, vector<1x8x8xf32> -> vector<1x8x8xf32>
    "tpu.trace_stop"() : () -> ()
    %80 = tpu.concatenate %31, %47, %63, %79 in 2 : vector<1x8x8xf32>, vector<1x8x8xf32>, vector<1x8x8xf32>, vector<1x8x8xf32> -> vector<1x8x32xf32>
    %81 = vector.shape_cast %80 : vector<1x8x32xf32> to vector<8x32xf32>
    %82 = arith.truncf %81 : vector<8x32xf32> to vector<8x32xbf16>
    %c0_21 = arith.constant 0 : index
    %c0_22 = arith.constant 0 : index
    %83 = vector.load %arg4[%c0_21, %c0_22] : memref<32x32xbf16, #tpu.memory_space<vmem>>, vector<32x32xbf16>
    %cst_23 = arith.constant dense<0.000000e+00> : vector<8x32xf32>
    %84 = tpu.matmul %82, %83, %cst_23 {dimension_numbers = #tpu.dot_dimension_numbers<[1], [0], [0], [1], [0, 0, 1, 1], [], []>} : vector<8x32xbf16>, vector<32x32xbf16>, vector<8x32xf32> -> vector<8x32xf32>
    %c0_24 = arith.constant 0 : index
    %c0_25 = arith.constant 0 : index
    %85 = vector.load %arg5[%c0_24, %c0_25] : memref<1x32xf32, #tpu.memory_space<vmem>>, vector<1x32xf32>
    %86 = vector.broadcast %85 : vector<1x32xf32> to vector<8x32xf32>
    %87 = arith.addf %84, %86 : vector<8x32xf32>
    %c0_26 = arith.constant 0 : index
    %c0_27 = arith.constant 0 : index
    %88 = vector.load %arg6[%c0_26, %c0_27] : memref<8x32xf32, #tpu.memory_space<vmem>>, vector<8x32xf32>
    tpu.vector_store %arg6[%c0_26, %c0_27], %87 {strides = array<i32>} : memref<8x32xf32, #tpu.memory_space<vmem>>, vector<8x32xf32>,
    return
  }
  func.func @transform_0(%arg0: i32) -> (i32, i32) {
    %c0_i32 = arith.constant 0 : i32
    %c0_i32_0 = arith.constant 0 : i32
    return %arg0, %c0_i32 : i32, i32
  }
  func.func @transform_1(%arg0: i32) -> (i32, i32) {
    %c0_i32 = arith.constant 0 : i32
    %c0_i32_0 = arith.constant 0 : i32
    %c0_i32_1 = arith.constant 0 : i32
    return %c0_i32, %c0_i32_0 : i32, i32
  }
  func.func @transform_2(%arg0: i32) -> (i32, i32) {
    %c0_i32 = arith.constant 0 : i32
    %c0_i32_0 = arith.constant 0 : i32
    %c0_i32_1 = arith.constant 0 : i32
    return %c0_i32, %c0_i32_0 : i32, i32
  }
  func.func @transform_3(%arg0: i32) -> (i32, i32) {
    %c0_i32 = arith.constant 0 : i32
    %c0_i32_0 = arith.constant 0 : i32
    %c0_i32_1 = arith.constant 0 : i32
    return %c0_i32, %c0_i32_0 : i32, i32
  }
  func.func @transform_4(%arg0: i32) -> (i32, i32) {
    %c0_i32 = arith.constant 0 : i32
    %c0_i32_0 = arith.constant 0 : i32
    %c0_i32_1 = arith.constant 0 : i32
    return %c0_i32, %c0_i32_0 : i32, i32
  }
  func.func @transform_5(%arg0: i32) -> (i32, i32) {
    %c0_i32 = arith.constant 0 : i32
    %c0_i32_0 = arith.constant 0 : i32
    return %arg0, %c0_i32 : i32, i32
  }
}

</mosaic_0001>

<bundles_post_ra>
// kernel: tpu_custom_call.1
= control target key start
LH: loop header
LB: loop body
LE: loop exit
PB: predicated region body
PF: predicated region fallthrough
CT: control target
= control target key end

     0   :  { %10 = vsyncpa [#allocation3], 0  ;;  %s1715_s0 = inlined_call_operand.hbm [shape: f32[16,32], index: 0, kind: input, shape index: {}]   ;;  %s1716_s1 = inlined_call_operand.hbm [shape: bf16[32,96], index: 1, kind: input, shape index: {}]   ;;  %s1717_s2 = inlined_call_operand.vmem [shape: f32[1,96], index: 2, kind: input, shape index: {}]   ;;  %s1718_s3 = inlined_call_operand.hbm [shape: bf16[32,32], index: 3, kind: input, shape index: {}]   ;;  %s1719_s4 = inlined_call_operand.vmem [shape: f32[1,32], index: 4, kind: input, shape index: {}]   ;;  %s1720_s5 = inlined_call_operand.hbm [shape: f32[16,32], index: 5, kind: output, shape index: {}]  }
   0x1   :  { %12 = vsyncpa [#allocation3 + $0x1], 0 }
   0x2   :  { %13 = vsyncpa [#allocation6], 0 }
   0x3   :  { %14 = vsyncpa [#allocation4], 0 }
   0x4   :  { %16 = vsyncpa [#allocation4 + $0x1], 0  ;;  %s1402_s18 = smov 0   ;;  %s1404_s19 = smov 0  }
   0x5   :  { %s1406_s20 = smov 0   ;;  %s1408_s21 = smov 0  }
   0x6 LB: > { %s1423_s22 = sadd.s32 4294967295, %s1348_s21   ;;  %s969_s23 = sadd.s32 4294967294, %s1348_s21   ;;  %s1348_s21 = sphi %s1408_s21, %s1740_s21   ;;  %s1344_s20 = sphi %s1406_s20, %s1739_s20   ;;  %s1340_s19 = sphi %s1404_s19, %s1738_s19   ;;  %s1336_s18 = sphi %s1402_s18, %s1737_s18  }
   0x7   : > { %p42_p0 = scmp.ne.s32.totalorder %s1340_s19, %s1336_s18  ;;  %p1721_p1 = scmp.eq.s32.totalorder %s1423_s22, 0 }
   0x8   : > { %p156_p3 = scmp.eq.s32.totalorder %s969_s23, 1  ;;  %p970_p5 = scmp.ge.s32.totalorder %s1348_s21, 1 }
   0x9   : > { %p1432_p4 = por %p1721_p1, %p42_p0  ;;  %p163_p7 = scmp.lt.s32.totalorder %s1348_s21, 3 }
   0xa   : > { %p1437_p6 = por %p156_p3, %p42_p0  ;;  %s1350_s27 = smov [#allocation5]  }
   0xb   : > { %s1724_s24 = scalar_select %p1432_p4, 1, 0 }
   0xc   : > { %s1725_s25 = scalar_select %p1437_p6, 1, 0 }
   0xd   : > { %p1442_p8 = pnand %p970_p5, %p163_p7  ;;  %s175_s28 = sshll.u32 %s1350_s27, 4  ;;  %s1446_s28 = int_to_ptr.vmem [resolvable:$true] %s175_s28 }
   0xe   : > { %s1351_s30 = smov [#allocation7]   ;;  %s1192_s9 = scalar_lea.hbm %s1716_s1, 256 }
   0xf   : > { %p1099_p9 = pneg %p1442_p8  ;;  %s191_s6 = sshll.u32 %s1351_s30, 4  ;;  %s1457_s6 = int_to_ptr.vmem [resolvable:$true] %s191_s6 }
  0x10   : > { %p1193_p12 = scmp.ne.s32.totalorder %s1716_s1, %s1192_s9  ;;  %p1199_p5 = scmp.lt.u32.totalorder %s1192_s9, %s1716_s1 }
  0x11   : > { %p1453_p11 = pnand %p1099_p9, %p1721_p1 }
  0x13   : > { %p1194_p13 = pneg %p1453_p11 }
  0x15   : > { %p1195_p0 = pnand %p1194_p13, %p1193_p12 }
  0x17   : > { %p1196_p3 = pneg %p1195_p0 }
  0x19   : > { %p1201_p7 = pnand %p1199_p5, %p1196_p3 }
  0x1b   : > { %1204 = shalt.err (!%p1201_p7)
}
  0x1c   : > { %s1205_s14 = scalar_lea.vmem %s1446_s28, 256  ;;  %p1213_p2 = scmp.lt.s32.totalorder %s1446_s28, %s1446_s28 }
  0x1d   : > { %p1206_p9 = scmp.ne.s32.totalorder %s1446_s28, %s1205_s14  ;;  %p1214_p12 = scmp.lt.s32.totalorder %s1205_s14, %s1205_s14 }
  0x1f   : > { %p1208_p10 = pnand %p1206_p9, %p1194_p13  ;;  %p1215_p0 = por %p1214_p12, %p1213_p2 }
  0x21   : > { %p1209_p1 = pneg %p1208_p10 }
  0x23   : > { %p1216_p6 = pnand %p1215_p0, %p1209_p1 }
  0x25   : > { %1219 = shalt.err (!%p1216_p6)
}
  0x26   : > { %s1352_s15 = smov 64   ;;  %s1353_s16 = smov 4  }
  0x27   : > { %1102 = dma.hbm_to_vmem [thread:$0]  (!%p1453_p11), %s1716_s1, 256, %s1446_s28, [#allocation6], %s1352_s15, %s1352_s15, %s1353_s16  }
  0x28   : > { %s1220_s7 = scalar_lea.hbm %s1718_s3, 256 }
  0x29   : > { %p1221_p2 = scmp.ne.s32.totalorder %s1718_s3, %s1220_s7  ;;  %p1227_p10 = scmp.lt.u32.totalorder %s1220_s7, %s1718_s3 }
  0x2b   : > { %p1223_p1 = pnand %p1221_p2, %p1194_p13 }
  0x2d   : > { %p1224_p6 = pneg %p1223_p1 }
  0x2f   : > { %p1229_p3 = pnand %p1227_p10, %p1224_p6 }
  0x31   : > { %1232 = shalt.err (!%p1229_p3)
}
  0x32   : > { %s1233_s28 = scalar_lea.vmem %s1457_s6, 256  ;;  %p1241_p12 = scmp.lt.s32.totalorder %s1457_s6, %s1457_s6 }
  0x33   : > { %p1234_p5 = scmp.ne.s32.totalorder %s1457_s6, %s1233_s28  ;;  %p1242_p0 = scmp.lt.s32.totalorder %s1233_s28, %s1233_s28 }
  0x35   : > { %p1236_p7 = pnand %p1234_p5, %p1194_p13  ;;  %p1243_p2 = por %p1242_p0, %p1241_p12 }
  0x37   : > { %p1237_p9 = pneg %p1236_p7 }
  0x39   : > { %p1244_p1 = pnand %p1243_p2, %p1237_p9 }
  0x3b   : > { %1247 = shalt.err (!%p1244_p1)
}
  0x3c   : > { %1105 = dma.hbm_to_vmem [thread:$0]  (!%p1453_p11), %s1718_s3, 256, %s1457_s6, [#allocation6], %s1352_s15, %s1352_s15, %s1353_s16  }
  0x3d   : > { %s1512_s14 = sadd.s32 1, %s1348_s21   ;;  %s29_s29 = sadd.s32 1, %s1344_s20 }
  0x3e   : > { %s26_s17 = ssub.s32 %s1348_s21, %s1512_s14  ;;  %p36_p13 = scmp.ne.s32.totalorder %s1344_s20, %s1340_s19 }
  0x3f   : > { %p27_p6 = scmp.eq.s32.totalorder %s26_s17, 0  ;;  %p37_p10 = scmp.eq.s32.totalorder %s1348_s21, 0 }
  0x40   : > { %p1728_p3 = scmp.eq.s32.totalorder %s1423_s22, 1  ;;  %p1116_p7 = scmp.lt.s32.totalorder %s1348_s21, 2 }
  0x41   : > { %s1528_s27 = scalar_select %p27_p6, %s1344_s20, %s29_s29  }
  0x42   : > { %p1522_p5 = por %p1728_p3, %p36_p13  ;;  %p38_p9 = por %p37_p10, %p36_p13 }
  0x43   : > { %s208_s30 = sand.u32 1, %s1344_s20   ;;  %s975_s6 = sshll.u32 %s1348_s21, 7 }
  0x44   : > { %s1729_s23 = scalar_select %p1522_p5, 1, 0 }
  0x45   : > { %s974_s7 = sshll.u32 %s208_s30, 3  ;;  %s1535_s8 = scalar_lea.hbm %s1715_s0, %s975_s6 }
  0x46   : > { %s212_s9 = scalar_lea.vmem [#allocation2], %s974_s7  ;;  %p1539_p11 = pnand %p1116_p7, %p38_p9 }
  0x47   : > { %s219_s10 = sshll.u32 %s212_s9, 4  ;;  %s209_s28 = scalar_lea.sflag [#allocation3], %s208_s30  ;;  %s1537_s10 = int_to_ptr.vmem [resolvable:$true] %s219_s10 }
  0x48   : > { %s1248_s12 = scalar_lea.hbm %s1535_s8, 128  ;;  %p1250_p0 = pneg %p1539_p11 }
  0x49   : > { %p1249_p12 = scmp.ne.s32.totalorder %s1535_s8, %s1248_s12  ;;  %s1253_s17 = scalar_lea.hbm %s1715_s0, 256 }
  0x4a   : > { %p1254_p13 = scmp.lt.u32.totalorder %s1535_s8, %s1715_s0  ;;  %p1255_p6 = scmp.lt.u32.totalorder %s1253_s17, %s1248_s12 }
  0x4b   : > { %p1251_p2 = pnand %p1250_p0, %p1249_p12  ;;  %p1257_p3 = scmp.lt.u32.totalorder %s1248_s12, %s1535_s8 }
  0x4c   : > { %p1256_p10 = por %p1255_p6, %p1254_p13 }
  0x4d   : > { %p1252_p1 = pneg %p1251_p2 }
  0x4e   : > { %p1258_p7 = por %p1257_p3, %p1256_p10 }
  0x50   : > { %p1259_p9 = pnand %p1258_p7, %p1252_p1 }
  0x52   : > { %1262 = shalt.err (!%p1259_p9)
}
  0x53   : > { %s1263_s30 = scalar_lea.vmem %s1537_s10, 128  ;;  %s1354_s15 = smov [#allocation2]  }
  0x54   : > { %p1264_p12 = scmp.ne.s32.totalorder %s1537_s10, %s1263_s30  ;;  %s1268_s16 = sshll.u32 %s1354_s15, 4  ;;  %s1269_s16 = int_to_ptr.vmem [resolvable:$false] %s1268_s16 }
  0x55   : > { %s1270_s9 = scalar_lea.vmem %s1269_s16, 256  ;;  %p1271_p4 = scmp.lt.s32.totalorder %s1537_s10, %s1269_s16 }
  0x56   : > { %p1266_p2 = pnand %p1264_p12, %p1250_p0  ;;  %p1272_p13 = scmp.lt.s32.totalorder %s1270_s9, %s1263_s30 }
  0x58   : > { %p1267_p5 = pneg %p1266_p2  ;;  %p1273_p6 = por %p1272_p13, %p1271_p4 }
  0x5a   : > { %p1274_p10 = pnand %p1273_p6, %p1267_p5 }
  0x5c   : > { %1277 = shalt.err (!%p1274_p10)
}
  0x5d   : > { %1109 = dma.hbm_to_vmem [thread:$0]  (!%p1539_p11), %s1535_s8, 128, %s1537_s10, %s209_s28  }
  0x5e   : > { %228 = sbr.rel (%p1442_p8) target bundleno = 1602 (0x642), region = 40  ;;  %s1571_s12 = sand.u32 (!%p1442_p8), 1, %s1340_s19  }
  0x5f   : > { %s977_s13 = sshll.u32 (!%p1442_p8), %s1571_s12, 3  ;;  %s231_s29 = scalar_lea.sflag (!%p1442_p8), [#allocation3], %s1571_s12 }
  0x60   : > { %s234_s17 = scalar_lea.vmem (!%p1442_p8), [#allocation2], %s977_s13  ;;  %p1731_p4 = scmp.ne.s32.totalorder (!%p1442_p8), %s1724_s24, 0 }
  0x65   : > { %1323 = dma.done.wait (%p1731_p4), %s231_s29, 128  }
  0x66   : > { %1325 = vsyncadd (%p1731_p4), %s231_s29, 4294967168  ;;  %p1732_p5 = scmp.eq.s32.totalorder %s1423_s22, 0 }
  0x68   : > { %1327 = dma.done.wait (%p1732_p5), [#allocation6], 512   ;;  %p1733_p8 = pmov %p1732_p5 }
  0x69   : > { %v1355_v0 = vmov 0.0   ;;  %vm1356_vm0 = vmmov 0   ;;  %v1172_v1 = vld [vmem:[#allocation5] sm:$0xff]   ;;  %v1173_v2 = vld [vmem:[#allocation5 + $0x8] sm:$0xff]   ;;  %v270_v3 = vld [vmem:[%s234_s17] sm:$0xff]  ;;  %vm295_vm1 = vcmask 261120  }
  0x6a   : > { %1329 = vsyncadd (%p1733_p8), [#allocation6], 4294966784  ;;  %1023 = vmatprep.subr.bf16.mxu0 %v1355_v0  ;;  %1027 = vmatprep.mubr.msk.bf16.mxu0 %vm1356_vm0, %v1355_v0  ;;  %v271_v4 = vpack.c.bf16 %v270_v3, %v270_v3  ;;  %v981_v5 = vld [vmem:[%s1717_s2] ss:$0 sm:$0xff]  ;;  %s1357_s8 = smov 120   ;;  %s1358_s10 = smov 96  }
  0x6b   : > { %1031 = vmatprep.subr.bf16.mxu1 %v1355_v0  ;;  %1033 = vmatprep.mubr.msk.bf16.mxu1 %vm1356_vm0, %v1355_v0  ;;  %s1359_s11 = smov 80   ;;  %s1360_s28 = smov 88   ;;  %vm343_vm2 = vcmask 64512   ;;  %vm407_vm3 = vcmask 1043456   ;;  %vm794_vm4 = vcmask 130048   ;;  %vm796_vm5 = vcmask 195584  }
  0x6c   : > { %1024 = vmatpush3.bf16.msra.mxu0 %v1172_v1  ;;  %s1361_s7 = smov 72   ;;  %s1362_s6 = smov 112  }
  0x6d   : > { %1025 = vmatprep.subr.bf16.mxu0 %v1355_v0  ;;  %s1363_s30 = smov 104   ;;  %s1364_s15 = smov 56  }
  0x6e   : > { %s1365_s16 = smov 64   ;;  %s1366_s9 = smov 40  }
  0x6f   : > { %s1367_s29 = smov 48   ;;  %s1368_s17 = smov 8  }
  0x70   : > { %1026 = vmatpush3.bf16.msra.mxu0 %v1173_v2  ;;  %s1369_s24 = smov 16   ;;  %s1370_s26 = smov 24  }
  0x71   : > { %1037 = vmatprep.subr.bf16.mxu0 %v1355_v0  ;;  %p1734_p0 = scmp.ne.s32.totalorder %s1729_s23, 0 }
  0x73   : > { %1028 = vmatmul.mubr.msk.bf16.vlgmr.msra.gmra.mrb[0].mxu0 %vm295_vm1, %v271_v4 }
  0x74   : > { %1039 = vmatprep.mubr.msk.bf16.mxu0 %vm1356_vm0, %v1355_v0 }
 0x146   : > { %v333_v6 = vpop.f32.mrb[0].mxu0 }
 0x147   : > { %v334_v7 = vadd.f32 %v981_v5, %v333_v6  ;;  %v1029_v8 = vpop.f32.mrb[1].mxu0 }
 0x148   : > { %v336_v9 = vpop.f32.mrb[2].mxu0 }
 0x149   : > { %v1599_v10 = vpack.c.bf16 %v334_v7, %v334_v7  ;;  %v1030_v11 = vpop.f32.mrb[3].mxu0 }
 0x14b   : > { %451 = vrot.lane.b32.xlu1 %v1599_v10, %s1357_s8  ;;  %341 = vrot.lane.b32.xlu0 %v1599_v10, %s1358_s10 }
 0x14f   : > { %563 = vrot.lane.b32.xlu1 %v1599_v10, %s1359_s11  ;;  %453 = vrot.lane.b32.xlu0 %v1599_v10, %s1360_s28  ;;  %s998_s11 = sshll.u32 %s1423_s22, 7  ;;  %s268_s28 = scalar_lea.vmem [#allocation8], %s977_s13 }
 0x150   : > { %s867_s22 = scalar_lea.sflag [#allocation4], %s1571_s12 }
 0x153   : > { %673 = vrot.lane.b32.xlu1 %v1599_v10, %s1361_s7  ;;  %561 = vrot.lane.b32.xlu0 %v1599_v10, %s1362_s6  ;;  %s880_s7 = sshll.u32 %s268_s28, 4  ;;  %s1672_s7 = int_to_ptr.vmem [resolvable:$true] %s880_s7 }
 0x154   : > { %s1278_s13 = scalar_lea.vmem %s1672_s7, 128 }
 0x155   : > { %p1279_p11 = scmp.ne.s32.totalorder %s1672_s7, %s1278_s13 }
 0x157   : > { %671 = vrot.lane.b32.xlu0 %v1599_v10, %s1363_s30  ;;  %p1280_p1 = pnand %p1279_p11, %p1734_p0 }
 0x159   : > { %p1281_p3 = pneg %p1280_p1 }
 0x1bd   : > { %v342_v12 = vpop.permute.xlu0 %341  ;;  %v452_v15 = vpop.permute.xlu1 %451 }
 0x1be   : > { %v348_v13 = vsel %vm343_vm2, %v342_v12, 0 }
 0x1bf   : > { %1032 = vmatpush3.bf16.xpose.msra.mxu1 %v348_v13 }
 0x1c0   : > { %1043 = vmatprep.subr.bf16.mxu1 %v1355_v0 }
 0x1c1   : > { %v454_v14 = vpop.permute.xlu0 %453  ;;  %v564_v17 = vpop.permute.xlu1 %563 }
 0x1c2   : > { %v459_v16 = vsel %vm343_vm2, %v454_v14, 0  ;;  %v569_v18 = vsel %vm343_vm2, %v564_v17, 0 }
 0x1c5   : > { %v674_v19 = vpop.permute.xlu1 %673  ;;  %v562_v20 = vpop.permute.xlu0 %561 }
 0x1c6   : > { %1034 = vmatmul.mubr.msk.bf16.vlgmr.msra.gmra.mrb[0].mxu1 %vm343_vm2, %v1599_v10  ;;  %v679_v21 = vsel %vm343_vm2, %v674_v19, 0 }
 0x1c7   : > { %1044 = vmatpush3.bf16.xpose.msra.mxu1 %v459_v16  ;;  %1045 = vmatprep.mubr.msk.bf16.mxu1 %vm1356_vm0, %v1355_v0 }
 0x1c8   : > { %1055 = vmatprep.subr.bf16.mxu1 %v1355_v0 }
 0x1c9   : > { %v672_v22 = vpop.permute.xlu0 %671 }
 0x1ce   : > { %1046 = vmatmul.mubr.msk.bf16.vlgmr.msra.gmra.mrb[4].mxu1 %vm343_vm2, %v452_v15 }
 0x1cf   : > { %1056 = vmatpush3.bf16.xpose.msra.mxu1 %v569_v18  ;;  %1057 = vmatprep.mubr.msk.bf16.mxu1 %vm1356_vm0, %v1355_v0 }
 0x1d0   : > { %1067 = vmatprep.subr.bf16.mxu1 %v1355_v0 }
 0x1d6   : > { %1058 = vmatmul.mubr.msk.bf16.vlgmr.msra.gmra.mrb[8].mxu1 %vm343_vm2, %v562_v20 }
 0x1d7   : > { %1068 = vmatpush3.bf16.xpose.msra.mxu1 %v679_v21  ;;  %1069 = vmatprep.mubr.msk.bf16.mxu1 %vm1356_vm0, %v1355_v0 }
 0x1d8   : > { %1079 = vmatprep.subr.bf16.mxu1 %v1355_v0 }
 0x1de   : > { %1070 = vmatmul.mubr.msk.bf16.vlgmr.msra.gmra.mrb[12].mxu1 %vm343_vm2, %v672_v22 }
 0x1df   : > { %1083 = vmatprep.mubr.msk.bf16.mxu1 %vm1356_vm0, %v1355_v0 }
 0x299   : > { %v384_v23 = vpop.f32.mrb[0].mxu1 }
 0x29a   : > { %v1035_v24 = vpop.f32.mrb[1].mxu1  ;;  %v390_v25 = vsel %vm343_vm2, %v384_v23, -inf }
 0x29b   : > { %391 = vmax.xlane.f32.xlu1 %v390_v25  ;;  %v387_v26 = vpop.f32.mrb[2].mxu1 }
 0x29c   : > { %v1036_v27 = vpop.f32.mrb[3].mxu1 }
 0x2a1   : > { %v495_v28 = vpop.f32.mrb[4].mxu1 }
 0x2a2   : > { %v1047_v29 = vpop.f32.mrb[5].mxu1  ;;  %v501_v30 = vsel %vm343_vm2, %v495_v28, -inf }
 0x2a3   : > { %502 = vmax.xlane.f32.xlu0 %v501_v30  ;;  %v498_v31 = vpop.f32.mrb[6].mxu1 }
 0x2a4   : > { %v1048_v32 = vpop.f32.mrb[7].mxu1 }
 0x2a5   : > { %v1174_v32 = vld [vmem:[#allocation7] sm:$0xff]  }
 0x2a6   : > { %1080 = vmatpush3.bf16.msra.mxu1 %v1174_v32 }
 0x2a7   : > { %1081 = vmatprep.subr.bf16.mxu1 %v1355_v0 }
 0x2a9   : > { %v605_v33 = vpop.f32.mrb[8].mxu1 }
 0x2aa   : > { %v1059_v34 = vpop.f32.mrb[9].mxu1  ;;  %v611_v35 = vsel %vm343_vm2, %v605_v33, -inf }
 0x2ab   : > { %612 = vmax.xlane.f32.xlu0 %v611_v35  ;;  %v608_v36 = vpop.f32.mrb[10].mxu1 }
 0x2ac   : > { %v1060_v37 = vpop.f32.mrb[11].mxu1 }
 0x2b1   : > { %v715_v38 = vpop.f32.mrb[12].mxu1 }
 0x2b2   : > { %v1071_v39 = vpop.f32.mrb[13].mxu1  ;;  %v721_v40 = vsel %vm343_vm2, %v715_v38, -inf }
 0x2b3   : > { %722 = vmax.xlane.f32.xlu1 %v721_v40  ;;  %v718_v41 = vpop.f32.mrb[14].mxu1 }
 0x2b4   : > { %v1072_v42 = vpop.f32.mrb[15].mxu1 }
 0x328   : > { %v392_v43 = vpop.xlane.xlu1 %391 }
 0x329   : > { %v393_v44 = vsub.f32 %v384_v23, %v392_v43 }
 0x32b   : > { %v394_v45 = vmul.f32 1.442695, %v393_v44 }
 0x32d   : > { %1176 = vpow2.f32 %v394_v45 }
 0x330   : > { %v503_v46 = vpop.xlane.xlu0 %502 }
 0x331   : > { %v504_v47 = vsub.f32 %v495_v28, %v503_v46 }
 0x333   : > { %v505_v48 = vmul.f32 1.442695, %v504_v47 }
 0x335   : > { %1178 = vpow2.f32 %v505_v48  ;;  %v993_v48 = vld [vmem:[%s1719_s4] ss:$0 sm:$0xff] }
 0x337   : > { %v1177_v49 = vpop.eup %1176 }
 0x338   : > { %v613_v50 = vpop.xlane.xlu0 %612  ;;  %v396_v51 = vsel %vm343_vm2, %v1177_v49, 0.0 }
 0x339   : > { %v614_v52 = vsub.f32 %v605_v33, %v613_v50  ;;  %397 = vadd.xlane.f32.xlu0 %v396_v51  ;;  %v1175_v33 = vld [vmem:[#allocation7 + $0x8] sm:$0xff]  }
 0x33a   : > { %1082 = vmatpush3.bf16.msra.mxu1 %v1175_v33 }
 0x33b   : > { %v615_v53 = vmul.f32 1.442695, %v614_v52 }
 0x33d   : > { %1180 = vpow2.f32 %v615_v53 }
 0x33f   : > { %v1179_v54 = vpop.eup %1178 }
 0x340   : > { %v507_v55 = vsel %vm343_vm2, %v1179_v54, 0.0  ;;  %v723_v58 = vpop.xlane.xlu1 %722 }
 0x341   : > { %508 = vadd.xlane.f32.xlu1 %v507_v55  ;;  %v724_v59 = vsub.f32 %v715_v38, %v723_v58 }
 0x343   : > { %v725_v60 = vmul.f32 1.442695, %v724_v59 }
 0x345   : > { %1182 = vpow2.f32 %v725_v60 }
 0x347   : > { %v1181_v56 = vpop.eup %1180 }
 0x348   : > { %v617_v57 = vsel %vm343_vm2, %v1181_v56, 0.0 }
 0x349   : > { %618 = vadd.xlane.f32.xlu0 %v617_v57 }
 0x34f   : > { %v1183_v61 = vpop.eup %1182 }
 0x350   : > { %v727_v62 = vsel %vm343_vm2, %v1183_v61, 0.0 }
 0x352   : > { %513 = vrot.lane.b32.xlu1 %v1599_v10, %s1364_s15  ;;  %s1670_s15 = scalar_lea.hbm %s1720_s5, %s998_s11 }
 0x35f   : > { %402 = vrot.lane.b32.xlu0 %v1599_v10, %s1365_s16  ;;  %s1371_s16 = smov [#allocation8]  }
 0x363   : > { %733 = vrot.lane.b32.xlu0 %v1599_v10, %s1366_s9  ;;  %s1282_s9 = sshll.u32 %s1371_s16, 4  ;;  %s1283_s9 = int_to_ptr.vmem [resolvable:$false] %s1282_s9 }
 0x364   : > { %p1285_p7 = scmp.lt.s32.totalorder %s1672_s7, %s1283_s9 }
 0x376   : > { %728 = vadd.xlane.f32.xlu1 %v727_v62 }
 0x387   : > { %623 = vrot.lane.b32.xlu1 %v1599_v10, %s1367_s29  ;;  %s1284_s29 = scalar_lea.vmem %s1283_s9, 256 }
 0x388   : > { %p1286_p9 = scmp.lt.s32.totalorder %s1284_s29, %s1278_s13 }
 0x38a   : > { %p1287_p12 = por %p1286_p9, %p1285_p7 }
 0x38c   : > { %p1288_p2 = pnand %p1287_p12, %p1281_p3 }
 0x3c6   : > { %v398_v63 = vpop.xlane.xlu0 %397 }
 0x3c7   : > { %1184 = vrcp.f32 %v398_v63 }
 0x3ce   : > { %v509_v1 = vpop.xlane.xlu1 %508 }
 0x3cf   : > { %1186 = vrcp.f32 %v509_v1 }
 0x3d1   : > { %v1185_v2 = vpop.eup %1184 }
 0x3d2   : > { %v400_v4 = vmul.f32 %v1185_v2, %v1177_v49  ;;  %v514_v7 = vpop.permute.xlu1 %513 }
 0x3d3   : > { %v519_v11 = vsel %vm407_vm3, %v514_v7, 0 }
 0x3d4   : > { %v401_v8 = vpack.c.bf16 %v400_v4, %v400_v4 }
 0x3d6   : > { %v619_v3 = vpop.xlane.xlu0 %618 }
 0x3d7   : > { %1188 = vrcp.f32 %v619_v3 }
 0x3d9   : > { %v1187_v9 = vpop.eup %1186 }
 0x3da   : > { %v403_v5 = vpop.permute.xlu0 %402  ;;  %v511_v10 = vmul.f32 %v1187_v9, %v1179_v54 }
 0x3db   : > { %v409_v6 = vsel %vm407_vm3, %v403_v5, 0 }
 0x3dc   : > { %1038 = vmatpush3.bf16.msra.mxu0 %v409_v6  ;;  %v512_v12 = vpack.c.bf16 %v511_v10, %v511_v10 }
 0x3dd   : > { %1049 = vmatprep.subr.bf16.mxu0 %v1355_v0 }
 0x3de   : > { %v734_v18 = vpop.permute.xlu0 %733 }
 0x3df   : > { %1040 = vmatmul.mubr.msk.bf16.vlgmr.msra.gmra.mrb[4].mxu0 %vm343_vm2, %v401_v8  ;;  %v739_v20 = vsel %vm407_vm3, %v734_v18, 0 }
 0x3e0   : > { %1050 = vmatpush3.bf16.msra.mxu0 %v519_v11  ;;  %1051 = vmatprep.mubr.msk.bf16.mxu0 %vm1356_vm0, %v1355_v0 }
 0x3e1   : > { %1061 = vmatprep.subr.bf16.mxu0 %v1355_v0  ;;  %v1189_v13 = vpop.eup %1188 }
 0x3e2   : > { %v621_v15 = vmul.f32 %v1189_v13, %v1181_v56 }
 0x3e4   : > { %v622_v19 = vpack.c.bf16 %v621_v15, %v621_v15 }
 0x3e7   : > { %1052 = vmatmul.mubr.msk.bf16.vlgmr.msra.gmra.mrb[8].mxu0 %vm343_vm2, %v512_v12 }
 0x3e8   : > { %1063 = vmatprep.mubr.msk.bf16.mxu0 %vm1356_vm0, %v1355_v0 }
 0x403   : > { %v729_v14 = vpop.xlane.xlu1 %728 }
 0x404   : > { %1190 = vrcp.f32 %v729_v14 }
 0x407   : > { %v624_v16 = vpop.permute.xlu1 %623 }
 0x408   : > { %v629_v17 = vsel %vm407_vm3, %v624_v16, 0 }
 0x409   : > { %1062 = vmatpush3.bf16.msra.mxu0 %v629_v17 }
 0x40a   : > { %1073 = vmatprep.subr.bf16.mxu0 %v1355_v0 }
 0x40c   : > { %1064 = vmatmul.mubr.msk.bf16.vlgmr.msra.gmra.mrb[12].mxu0 %vm343_vm2, %v622_v19 }
 0x40d   : > { %1074 = vmatpush3.bf16.msra.mxu0 %v739_v20  ;;  %1075 = vmatprep.mubr.msk.bf16.mxu0 %vm1356_vm0, %v1355_v0 }
 0x40e   : > { %v1191_v21 = vpop.eup %1190 }
 0x40f   : > { %v731_v22 = vmul.f32 %v1191_v21, %v1183_v61 }
 0x411   : > { %v732_v23 = vpack.c.bf16 %v731_v22, %v731_v22 }
 0x414   : > { %1076 = vmatmul.mubr.msk.bf16.vlgmr.msra.gmra.mrb[16].mxu0 %vm343_vm2, %v732_v23 }
 0x4b2   : > { %v445_v24 = vpop.f32.mrb[4].mxu0 }
 0x4b3   : > { %v1041_v25 = vpop.f32.mrb[5].mxu0 }
 0x4b4   : > { %v448_v26 = vpop.f32.mrb[6].mxu0 }
 0x4b5   : > { %v1042_v27 = vpop.f32.mrb[7].mxu0 }
 0x4ba   : > { %v555_v28 = vpop.f32.mrb[8].mxu0 }
 0x4bb   : > { %782 = vrot.lane.b32.xlu1 %v555_v28, %s1368_s17  ;;  %v1053_v29 = vpop.f32.mrb[9].mxu0 }
 0x4bc   : > { %v558_v30 = vpop.f32.mrb[10].mxu0 }
 0x4bd   : > { %v1054_v31 = vpop.f32.mrb[11].mxu0 }
 0x4df   : > { %v665_v34 = vpop.f32.mrb[12].mxu0 }
 0x4e0   : > { %786 = vrot.lane.b32.xlu0 %v665_v34, %s1369_s24  ;;  %v1065_v35 = vpop.f32.mrb[13].mxu0 }
 0x4e1   : > { %v668_v36 = vpop.f32.mrb[14].mxu0 }
 0x4e2   : > { %v1066_v37 = vpop.f32.mrb[15].mxu0 }
 0x4e7   : > { %v775_v38 = vpop.f32.mrb[16].mxu0 }
 0x4e8   : > { %790 = vrot.lane.b32.xlu1 %v775_v38, %s1370_s26  ;;  %v1077_v39 = vpop.f32.mrb[17].mxu0 }
 0x4e9   : > { %v778_v40 = vpop.f32.mrb[18].mxu0 }
 0x4ea   : > { %v1078_v41 = vpop.f32.mrb[19].mxu0 }
 0x52d   : > { %v783_v42 = vpop.permute.xlu1 %782 }
 0x52e   : > { %v793_v0 = vsel %vm343_vm2, %v445_v24, %v783_v42 }
 0x552   : > { %v787_v43 = vpop.permute.xlu0 %786 }
 0x553   : > { %v795_v44 = vsel %vm794_vm4, %v793_v0, %v787_v43 }
 0x55a   : > { %v791_v45 = vpop.permute.xlu1 %790 }
 0x55b   : > { %v797_v46 = vsel %vm796_vm5, %v795_v44, %v791_v45 }
 0x55c   : > { %v798_v47 = vpack.c.bf16 %v797_v46, %v797_v46 }
 0x55e   : > { %1084 = vmatmul.mubr.msk.bf16.vlgmr.msra.gmra.mrb[16].mxu1 %vm295_vm1, %v798_v47 }
 0x631   : > { %v859_v49 = vpop.f32.mrb[16].mxu1 }
 0x632   : > { %v860_v50 = vadd.f32 %v993_v48, %v859_v49  ;;  %v1085_v51 = vpop.f32.mrb[17].mxu1 }
 0x633   : > { %v862_v52 = vpop.f32.mrb[18].mxu1 }
 0x634   : > { %v1086_v53 = vpop.f32.mrb[19].mxu1  ;;  %865 = vst.msk [vmem:[%s268_s28] sm:$0xff] %vm295_vm1, %v860_v50 }
 0x635   : > { %1291 = shalt.err (!%p1288_p2)
}
 0x636   : > { %s1292_s12 = scalar_lea.hbm %s1670_s15, 128  ;;  %s1296_s26 = scalar_lea.hbm %s1720_s5, 256 }
 0x637   : > { %p1293_p13 = scmp.ne.s32.totalorder %s1670_s15, %s1292_s12  ;;  %p1297_p4 = scmp.lt.u32.totalorder %s1670_s15, %s1720_s5 }
 0x638   : > { %p1298_p5 = scmp.lt.u32.totalorder %s1296_s26, %s1292_s12  ;;  %p1300_p11 = scmp.lt.u32.totalorder %s1292_s12, %s1670_s15 }
 0x639   : > { %p1294_p6 = pnand %p1293_p13, %p1734_p0 }
 0x63a   : > { %p1299_p8 = por %p1298_p5, %p1297_p4 }
 0x63b   : > { %p1295_p10 = pneg %p1294_p6 }
 0x63c   : > { %p1301_p1 = por %p1300_p11, %p1299_p8 }
 0x63e   : > { %p1302_p3 = pnand %p1301_p1, %p1295_p10 }
 0x640   : > { %1305 = shalt.err (!%p1302_p3)
}
 0x641   : > { %1097 = dma.vmem_to_hbm [thread:$0]  (%p1734_p0), %s1672_s7, 128, %s1670_s15, %s867_s22  }
 0x642 PF: > { %s892_s11 = sand.u32 1, %s1336_s18   ;;  %p1735_p7 = scmp.ne.s32.totalorder %s1725_s25, 0 }
 0x643   : > { %p1736_p9 = scmp.ge.s32.totalorder %s1348_s21, 2  ;;  %s893_s28 = scalar_lea.sflag [#allocation4], %s892_s11 }
 0x645   : > { %p1111_p12 = pnand %p1736_p9, %p1735_p7 }
 0x647   : > { %1331 = dma.done.wait (!%p1111_p12), %s893_s28, 128  }
 0x648   : > { %1333 = vsyncadd (!%p1111_p12), %s893_s28, 4294967168  ;;  %p19_p2 = scmp.ge.s32.totalorder %s1512_s14, 4   ;;  %s1737_s18 = smov %s1340_s19 }
 0x649   : > { %s1738_s19 = smov %s1344_s20  ;;  %s1739_s20 = smov %s1528_s27 }
 0x64a   : > { %s1740_s21 = smov %s1512_s14  ;;  %21 = sbr.rel (!%p19_p2) target bundleno = 6 (0x6), region = 93 }
 0x651   :  { %898 = vsyncpa [#allocation3], 1 }
 0x652   :  { %900 = vsyncpa [#allocation3 + $0x1], 1 }
 0x653   :  { %901 = vsyncpa [#allocation6], 1 }
 0x654   :  { %902 = vsyncpa [#allocation4], 1 }
 0x655   :  { %904 = vsyncpa [#allocation4 + $0x1], 1 }

</bundles_post_ra>
